<compile_context>
chip_gen: v7x
topology: tpu7x:2x2x1
jax: 0.10.0
libtpu: 0.0.40
codegen_flags: <defaults>
</compile_context>

<pallas_src>
import functools

import jax
import jax.numpy as jnp
from jax.experimental import pallas as pl
from jax.experimental.pallas import tpu as pltpu


def _round_up(x, m):
    return (x + m - 1) // m * m


def gfu_kernel(cur_ref, new_ref,
               wg_c_ref, wg_n_ref, bg_ref,
               wc_c_ref, wc_n_ref, bc_ref,
               gamma_ref, beta_ref,
               out_ref, *, d_true, mm_dtype):
    # Activations arrive in f32; cast only the MXU operands to the matmul dtype.
    cur = cur_ref[...]                       # (rt, Dp) f32
    new = new_ref[...]
    cur_mm = cur.astype(mm_dtype)
    new_mm = new.astype(mm_dtype)

    # gate = sigmoid(cat([cur, new]) @ Wg^T + bg)   (split matmuls, f32 accumulate)
    gate_pre = (jnp.dot(cur_mm, wg_c_ref[...], preferred_element_type=jnp.float32)
                + jnp.dot(new_mm, wg_n_ref[...], preferred_element_type=jnp.float32)
                + bg_ref[...])
    gate = jax.nn.sigmoid(gate_pre)

    # candidate = tanh(cat([cur, new]) @ Wc^T + bc)
    cand_pre = (jnp.dot(cur_mm, wc_c_ref[...], preferred_element_type=jnp.float32)
                + jnp.dot(new_mm, wc_n_ref[...], preferred_element_type=jnp.float32)
                + bc_ref[...])
    cand = jnp.tanh(cand_pre)

    # GRU-style fusion: (1-g)*cur + g*cand == cur + g*(cand - cur)
    # Padded lanes are exactly zero (zero inputs, zero weight cols, zero bias).
    new_state = cur + gate * (cand - cur)

    # LayerNorm over the true D columns (biased variance, eps inside rsqrt).
    d_pad = new_state.shape[-1]
    inv_d = 1.0 / d_true
    mean = jnp.sum(new_state, axis=-1, keepdims=True) * inv_d   # pads are 0
    centered = new_state - mean
    if d_pad == d_true:
        centered_stat = centered
    else:
        lane = jax.lax.broadcasted_iota(jnp.int32, new_state.shape, 1)
        centered_stat = jnp.where(lane < d_true, centered, 0.0)
    var = jnp.sum(centered_stat * centered_stat, axis=-1, keepdims=True) * inv_d
    inv = jax.lax.rsqrt(var + 1e-5)
    normed = centered * inv * gamma_ref[...] + beta_ref[...]

    out_ref[...] = normed.astype(out_ref.dtype)


def gated_fusion_unit(current_state, new_info, params, *,
                      row_tile=256, matmul_dtype=jnp.bfloat16):
    """current_state, new_info: (B, S, D) float32. Returns (B, S, D) float32."""
    B, S, D = current_state.shape
    T = B * S
    Dp = _round_up(D, 128)                         # lane-dense last dim
    rt = _round_up(min(row_tile, _round_up(T, 8)), 8)
    Tp = _round_up(T, rt)

    def pad_act(x):
        return jnp.pad(x.reshape(T, D).astype(jnp.float32),
                       ((0, Tp - T), (0, Dp - D)))

    cur2d = pad_act(current_state)
    new2d = pad_act(new_info)

    wg_c, wg_n, bg, wc_c, wc_n, bc, gamma, beta = params

    def pad_w(w):   # (D, D) -> (Dp, Dp), matmul dtype (bf16 by default)
        return jnp.pad(w.astype(jnp.float32),
                       ((0, Dp - D), (0, Dp - D))).astype(matmul_dtype)

    def pad_v(v):   # (1, D) -> (1, Dp), f32 (elementwise path stays f32)
        return jnp.pad(v.reshape(1, D).astype(jnp.float32), ((0, 0), (0, Dp - D)))

    args = (cur2d, new2d,
            pad_w(wg_c), pad_w(wg_n), pad_v(bg),
            pad_w(wc_c), pad_w(wc_n), pad_v(bc),
            pad_v(gamma), pad_v(beta))

    row_spec = pl.BlockSpec((rt, Dp), lambda i: (i, 0))
    # Weights / biases / LN params: fully resident in VMEM, single copy, no
    # per-step double buffering.
    resident = pl.BlockSpec(memory_space=pltpu.MemorySpace.VMEM)

    wbytes = jnp.dtype(matmul_dtype).itemsize
    cost = pl.CostEstimate(
        flops=8 * Tp * Dp * Dp + 10 * Tp * Dp,
        transcendentals=2 * Tp * Dp,
        bytes_accessed=3 * Tp * Dp * 4 + 4 * Dp * Dp * wbytes + 4 * Dp * 4,
    )

    kernel = functools.partial(gfu_kernel, d_true=D, mm_dtype=matmul_dtype)

    out = pl.pallas_call(
        kernel,
        out_shape=jax.ShapeDtypeStruct((Tp, Dp), jnp.float32),
        grid_spec=pltpu.PrefetchScalarGridSpec(
            num_scalar_prefetch=0,
            grid=(Tp // rt,),
            in_specs=[row_spec, row_spec,
                      resident, resident, resident,
                      resident, resident, resident,
                      resident, resident],
            out_specs=row_spec,
        ),
        compiler_params=pltpu.CompilerParams(
            dimension_semantics=("parallel",),   # megacore-splittable row axis
            vmem_limit_bytes=64 * 1024 * 1024,   # fits v7x's 64 MiB physical VMEM
        ),
        cost_estimate=cost,
    )(*args)

    return out[:T, :D].reshape(B, S, D)


def make_params(key, d_model):
    """Deterministic synthetic parameters matching nn.Linear(2D, D) x2 + LayerNorm(D)."""
    ks = jax.random.split(key, 6)
    scale = 1.0 / jnp.sqrt(2.0 * d_model)
    # Full linear weights (D, 2D) in PyTorch convention; split & transpose to (D, D).
    Wg = jax.random.uniform(ks[0], (d_model, 2 * d_model), jnp.float32, -scale, scale)
    bg = jax.random.uniform(ks[1], (1, d_model), jnp.float32, -scale, scale)
    Wc = jax.random.uniform(ks[2], (d_model, 2 * d_model), jnp.float32, -scale, scale)
    bc = jax.random.uniform(ks[3], (1, d_model), jnp.float32, -scale, scale)
    gamma = jnp.ones((1, d_model), jnp.float32)
    beta = jnp.zeros((1, d_model), jnp.float32)

    wg_c = Wg[:, :d_model].T       # (D, D): cur @ wg_c == cur @ Wg[:, :D]^T
    wg_n = Wg[:, d_model:].T
    wc_c = Wc[:, :d_model].T
    wc_n = Wc[:, d_model:].T
    return (wg_c, wg_n, bg, wc_c, wc_n, bc, gamma, beta)


def reference(current_state, new_info, params):
    wg_c, wg_n, bg, wc_c, wc_n, bc, gamma, beta = params
    gate = jax.nn.sigmoid(current_state @ wg_c + new_info @ wg_n + bg[0])
    cand = jnp.tanh(current_state @ wc_c + new_info @ wc_n + bc[0])
    ns = (1.0 - gate) * current_state + gate * cand
    mean = jnp.mean(ns, axis=-1, keepdims=True)
    var = jnp.mean((ns - mean) ** 2, axis=-1, keepdims=True)
    return (ns - mean) / jnp.sqrt(var + 1e-5) * gamma[0] + beta[0]


if __name__ == "__main__":
    B, S, D = 2, 8, 32
    key = jax.random.PRNGKey(0)
    k1, k2, k3 = jax.random.split(key, 3)

    current_state = jax.random.normal(k1, (B, S, D), jnp.float32)
    new_info = jax.random.normal(k2, (B, S, D), jnp.float32)
    params = make_params(k3, D)

    ref = reference(current_state, new_info, params)

    # Full-precision MXU path: tight check against the f32 reference.
    out_f32 = gated_fusion_unit(current_state, new_info, params,
                                matmul_dtype=jnp.float32)
    out_f32 = jax.block_until_ready(out_f32)
    assert out_f32.shape == (B, S, D)
    assert jnp.allclose(out_f32, ref, atol=1e-4, rtol=1e-4), "f32 path mismatch"

    # Default bf16 MXU path (perf configuration): reduced-precision tolerance.
    out_bf16 = gated_fusion_unit(current_state, new_info, params)
    out_bf16 = jax.block_until_ready(out_bf16)
    assert out_bf16.shape == (B, S, D)
    assert jnp.allclose(out_bf16, ref, atol=5e-2, rtol=5e-2), "bf16 path mismatch"

    print("KERNEL_OK")
</pallas_src>

<mosaic_0001>
module attributes {stable_mosaic.version = 11 : i64} {
  func.func @gfu_kernel(%arg0: i32, %arg1: memref<16x128xf32, #tpu.memory_space<vmem>>, %arg2: memref<16x128xf32, #tpu.memory_space<vmem>>, %arg3: memref<128x128xf32, #tpu.memory_space<vmem>>, %arg4: memref<128x128xf32, #tpu.memory_space<vmem>>, %arg5: memref<1x128xf32, #tpu.memory_space<vmem>>, %arg6: memref<128x128xf32, #tpu.memory_space<vmem>>, %arg7: memref<128x128xf32, #tpu.memory_space<vmem>>, %arg8: memref<1x128xf32, #tpu.memory_space<vmem>>, %arg9: memref<1x128xf32, #tpu.memory_space<vmem>>, %arg10: memref<1x128xf32, #tpu.memory_space<vmem>>, %arg11: memref<16x128xf32, #tpu.memory_space<vmem>>) attributes {dimension_semantics = [#tpu.dimension_semantics<parallel>], iteration_bounds = array<i64: 1>, scalar_prefetch = 0 : i64, scratch_operands = 0 : i64, tpu.core_type = #tpu.core_type<tc>, window_params = [{transform_indices = @transform_0, window_bounds = array<i64: 16, 128>}, {transform_indices = @transform_1, window_bounds = array<i64: 16, 128>}, {pipeline_mode = #tpu.pipeline_mode<synchronous>, transform_indices = @transform_2, window_bounds = array<i64: 128, 128>}, {pipeline_mode = #tpu.pipeline_mode<synchronous>, transform_indices = @transform_3, window_bounds = array<i64: 128, 128>}, {pipeline_mode = #tpu.pipeline_mode<synchronous>, transform_indices = @transform_4, window_bounds = array<i64: 1, 128>}, {pipeline_mode = #tpu.pipeline_mode<synchronous>, transform_indices = @transform_5, window_bounds = array<i64: 128, 128>}, {pipeline_mode = #tpu.pipeline_mode<synchronous>, transform_indices = @transform_6, window_bounds = array<i64: 128, 128>}, {pipeline_mode = #tpu.pipeline_mode<synchronous>, transform_indices = @transform_7, window_bounds = array<i64: 1, 128>}, {pipeline_mode = #tpu.pipeline_mode<synchronous>, transform_indices = @transform_8, window_bounds = array<i64: 1, 128>}, {pipeline_mode = #tpu.pipeline_mode<synchronous>, transform_indices = @transform_9, window_bounds = array<i64: 1, 128>}, {transform_indices = @transform_10, window_bounds = array<i64: 16, 128>}]} {
    %c0 = arith.constant 0 : index
    %c0_0 = arith.constant 0 : index
    %0 = vector.load %arg1[%c0, %c0_0] : memref<16x128xf32, #tpu.memory_space<vmem>>, vector<16x128xf32>
    %c0_1 = arith.constant 0 : index
    %c0_2 = arith.constant 0 : index
    %1 = vector.load %arg2[%c0_1, %c0_2] : memref<16x128xf32, #tpu.memory_space<vmem>>, vector<16x128xf32>
    %c0_3 = arith.constant 0 : index
    %c0_4 = arith.constant 0 : index
    %2 = vector.load %arg3[%c0_3, %c0_4] : memref<128x128xf32, #tpu.memory_space<vmem>>, vector<128x128xf32>
    %cst = arith.constant dense<0.000000e+00> : vector<16x128xf32>
    %3 = tpu.matmul %0, %2, %cst {dimension_numbers = #tpu.dot_dimension_numbers<[1], [0], [0], [1], [0, 0, 1, 1], [], []>} : vector<16x128xf32>, vector<128x128xf32>, vector<16x128xf32> -> vector<16x128xf32>
    %c0_5 = arith.constant 0 : index
    %c0_6 = arith.constant 0 : index
    %4 = vector.load %arg4[%c0_5, %c0_6] : memref<128x128xf32, #tpu.memory_space<vmem>>, vector<128x128xf32>
    %cst_7 = arith.constant dense<0.000000e+00> : vector<16x128xf32>
    %5 = tpu.matmul %1, %4, %cst_7 {dimension_numbers = #tpu.dot_dimension_numbers<[1], [0], [0], [1], [0, 0, 1, 1], [], []>} : vector<16x128xf32>, vector<128x128xf32>, vector<16x128xf32> -> vector<16x128xf32>
    %6 = arith.addf %3, %5 : vector<16x128xf32>
    %c0_8 = arith.constant 0 : index
    %c0_9 = arith.constant 0 : index
    %7 = vector.load %arg5[%c0_8, %c0_9] : memref<1x128xf32, #tpu.memory_space<vmem>>, vector<1x128xf32>
    %8 = vector.broadcast %7 : vector<1x128xf32> to vector<16x128xf32>
    %9 = arith.addf %6, %8 : vector<16x128xf32>
    %10 = arith.negf %9 : vector<16x128xf32>
    %11 = math.exp %10 : vector<16x128xf32>
    %cst_10 = arith.constant 1.000000e+00 : f32
    %12 = vector.broadcast %cst_10 : f32 to vector<16x128xf32>
    %13 = arith.addf %12, %11 : vector<16x128xf32>
    %14 = arith.divf %12, %13 : vector<16x128xf32>
    %c0_11 = arith.constant 0 : index
    %c0_12 = arith.constant 0 : index
    %15 = vector.load %arg6[%c0_11, %c0_12] : memref<128x128xf32, #tpu.memory_space<vmem>>, vector<128x128xf32>
    %cst_13 = arith.constant dense<0.000000e+00> : vector<16x128xf32>
    %16 = tpu.matmul %0, %15, %cst_13 {dimension_numbers = #tpu.dot_dimension_numbers<[1], [0], [0], [1], [0, 0, 1, 1], [], []>} : vector<16x128xf32>, vector<128x128xf32>, vector<16x128xf32> -> vector<16x128xf32>
    %c0_14 = arith.constant 0 : index
    %c0_15 = arith.constant 0 : index
    %17 = vector.load %arg7[%c0_14, %c0_15] : memref<128x128xf32, #tpu.memory_space<vmem>>, vector<128x128xf32>
    %cst_16 = arith.constant dense<0.000000e+00> : vector<16x128xf32>
    %18 = tpu.matmul %1, %17, %cst_16 {dimension_numbers = #tpu.dot_dimension_numbers<[1], [0], [0], [1], [0, 0, 1, 1], [], []>} : vector<16x128xf32>, vector<128x128xf32>, vector<16x128xf32> -> vector<16x128xf32>
    %19 = arith.addf %16, %18 : vector<16x128xf32>
    %c0_17 = arith.constant 0 : index
    %c0_18 = arith.constant 0 : index
    %20 = vector.load %arg8[%c0_17, %c0_18] : memref<1x128xf32, #tpu.memory_space<vmem>>, vector<1x128xf32>
    %21 = vector.broadcast %20 : vector<1x128xf32> to vector<16x128xf32>
    %22 = arith.addf %19, %21 : vector<16x128xf32>
    %23 = math.tanh %22 : vector<16x128xf32>
    %24 = arith.subf %23, %0 : vector<16x128xf32>
    %25 = arith.mulf %14, %24 : vector<16x128xf32>
    %26 = arith.addf %0, %25 : vector<16x128xf32>
    %cst_19 = arith.constant dense<0.000000e+00> : vector<16xf32>
    %27 = vector.multi_reduction <add>, %26, %cst_19 [1] : vector<16x128xf32> to vector<16xf32>
    %28 = vector.shape_cast %27 : vector<16xf32> to vector<16x1xf32>
    %cst_20 = arith.constant 3.125000e-02 : f32
    %29 = vector.broadcast %cst_20 : f32 to vector<16x1xf32>
    %30 = arith.mulf %28, %29 : vector<16x1xf32>
    %31 = vector.broadcast %30 : vector<16x1xf32> to vector<16x128xf32>
    %32 = arith.subf %26, %31 : vector<16x128xf32>
    %33 = tpu.iota {dimensions = array<i32: 1>} : vector<16x128xi32>
    %c32_i32 = arith.constant 32 : i32
    %34 = vector.broadcast %c32_i32 : i32 to vector<16x128xi32>
    %35 = arith.cmpi slt, %33, %34 : vector<16x128xi32>
    %cst_21 = arith.constant 0.000000e+00 : f32
    %36 = vector.broadcast %cst_21 : f32 to vector<16x128xf32>
    %37 = arith.select %35, %32, %36 : vector<16x128xi1>, vector<16x128xf32>
    %38 = arith.mulf %37, %37 : vector<16x128xf32>
    %cst_22 = arith.constant dense<0.000000e+00> : vector<16xf32>
    %39 = vector.multi_reduction <add>, %38, %cst_22 [1] : vector<16x128xf32> to vector<16xf32>
    %40 = vector.shape_cast %39 : vector<16xf32> to vector<16x1xf32>
    %cst_23 = arith.constant 3.125000e-02 : f32
    %41 = vector.broadcast %cst_23 : f32 to vector<16x1xf32>
    %42 = arith.mulf %40, %41 : vector<16x1xf32>
    %cst_24 = arith.constant 9.99999974E-6 : f32
    %43 = vector.broadcast %cst_24 : f32 to vector<16x1xf32>
    %44 = arith.addf %42, %43 : vector<16x1xf32>
    %45 = math.rsqrt %44 : vector<16x1xf32>
    %46 = vector.broadcast %45 : vector<16x1xf32> to vector<16x128xf32>
    %47 = arith.mulf %32, %46 : vector<16x128xf32>
    %c0_25 = arith.constant 0 : index
    %c0_26 = arith.constant 0 : index
    %48 = vector.load %arg9[%c0_25, %c0_26] : memref<1x128xf32, #tpu.memory_space<vmem>>, vector<1x128xf32>
    %49 = vector.broadcast %48 : vector<1x128xf32> to vector<16x128xf32>
    %50 = arith.mulf %47, %49 : vector<16x128xf32>
    %c0_27 = arith.constant 0 : index
    %c0_28 = arith.constant 0 : index
    %51 = vector.load %arg10[%c0_27, %c0_28] : memref<1x128xf32, #tpu.memory_space<vmem>>, vector<1x128xf32>
    %52 = vector.broadcast %51 : vector<1x128xf32> to vector<16x128xf32>
    %53 = arith.addf %50, %52 : vector<16x128xf32>
    %c0_29 = arith.constant 0 : index
    %c0_30 = arith.constant 0 : index
    %54 = vector.load %arg11[%c0_29, %c0_30] : memref<16x128xf32, #tpu.memory_space<vmem>>, vector<16x128xf32>
    tpu.vector_store %arg11[%c0_29, %c0_30], %53 {strides = array<i32>} : memref<16x128xf32, #tpu.memory_space<vmem>>, vector<16x128xf32>,
    return
  }
  func.func @transform_0(%arg0: i32) -> (i32, i32) {
    %c0_i32 = arith.constant 0 : i32
    %c0_i32_0 = arith.constant 0 : i32
    return %arg0, %c0_i32 : i32, i32
  }
  func.func @transform_1(%arg0: i32) -> (i32, i32) {
    %c0_i32 = arith.constant 0 : i32
    %c0_i32_0 = arith.constant 0 : i32
    return %arg0, %c0_i32 : i32, i32
  }
  func.func @transform_2(%arg0: i32) -> (i32, i32) {
    %c0_i32 = arith.constant 0 : i32
    %c0_i32_0 = arith.constant 0 : i32
    %c0_i32_1 = arith.constant 0 : i32
    return %c0_i32, %c0_i32_0 : i32, i32
  }
  func.func @transform_3(%arg0: i32) -> (i32, i32) {
    %c0_i32 = arith.constant 0 : i32
    %c0_i32_0 = arith.constant 0 : i32
    %c0_i32_1 = arith.constant 0 : i32
    return %c0_i32, %c0_i32_0 : i32, i32
  }
  func.func @transform_4(%arg0: i32) -> (i32, i32) {
    %c0_i32 = arith.constant 0 : i32
    %c0_i32_0 = arith.constant 0 : i32
    %c0_i32_1 = arith.constant 0 : i32
    return %c0_i32, %c0_i32_0 : i32, i32
  }
  func.func @transform_5(%arg0: i32) -> (i32, i32) {
    %c0_i32 = arith.constant 0 : i32
    %c0_i32_0 = arith.constant 0 : i32
    %c0_i32_1 = arith.constant 0 : i32
    return %c0_i32, %c0_i32_0 : i32, i32
  }
  func.func @transform_6(%arg0: i32) -> (i32, i32) {
    %c0_i32 = arith.constant 0 : i32
    %c0_i32_0 = arith.constant 0 : i32
    %c0_i32_1 = arith.constant 0 : i32
    return %c0_i32, %c0_i32_0 : i32, i32
  }
  func.func @transform_7(%arg0: i32) -> (i32, i32) {
    %c0_i32 = arith.constant 0 : i32
    %c0_i32_0 = arith.constant 0 : i32
    %c0_i32_1 = arith.constant 0 : i32
    return %c0_i32, %c0_i32_0 : i32, i32
  }
  func.func @transform_8(%arg0: i32) -> (i32, i32) {
    %c0_i32 = arith.constant 0 : i32
    %c0_i32_0 = arith.constant 0 : i32
    %c0_i32_1 = arith.constant 0 : i32
    return %c0_i32, %c0_i32_0 : i32, i32
  }
  func.func @transform_9(%arg0: i32) -> (i32, i32) {
    %c0_i32 = arith.constant 0 : i32
    %c0_i32_0 = arith.constant 0 : i32
    %c0_i32_1 = arith.constant 0 : i32
    return %c0_i32, %c0_i32_0 : i32, i32
  }
  func.func @transform_10(%arg0: i32) -> (i32, i32) {
    %c0_i32 = arith.constant 0 : i32
    %c0_i32_0 = arith.constant 0 : i32
    return %arg0, %c0_i32 : i32, i32
  }
}

</mosaic_0001>

<bundles_post_ra>
// kernel: tpu_custom_call.1
= control target key start
LH: loop header
LB: loop body
LE: loop exit
PB: predicated region body
PF: predicated region fallthrough
CT: control target
= control target key end

     0   :  { %15 = vsyncpa [#allocation3], 0  ;;  %s1522_s0 = inlined_call_operand.hbm [shape: f32[16,128], index: 0, kind: input, shape index: {}]   ;;  %s1523_s1 = inlined_call_operand.hbm [shape: f32[16,128], index: 1, kind: input, shape index: {}]   ;;  %s1524_s2 = inlined_call_operand.hbm [shape: f32[128,128], index: 2, kind: input, shape index: {}]   ;;  %s1525_s3 = inlined_call_operand.hbm [shape: f32[128,128], index: 3, kind: input, shape index: {}]   ;;  %s1526_s4 = inlined_call_operand.hbm [shape: f32[1,128], index: 4, kind: input, shape index: {}]   ;;  %s1527_s5 = inlined_call_operand.hbm [shape: f32[128,128], index: 5, kind: input, shape index: {}]   ;;  %s1528_s6 = inlined_call_operand.hbm [shape: f32[128,128], index: 6, kind: input, shape index: {}]   ;;  %s1529_s7 = inlined_call_operand.hbm [shape: f32[1,128], index: 7, kind: input, shape index: {}]   ;;  %s1530_s8 = inlined_call_operand.hbm [shape: f32[1,128], index: 8, kind: input, shape index: {}]   ;;  %s1531_s9 = inlined_call_operand.hbm [shape: f32[1,128], index: 9, kind: input, shape index: {}]   ;;  %s1532_s10 = inlined_call_operand.hbm [shape: f32[16,128], index: 10, kind: output, shape index: {}]  }
   0x1   :  { %16 = vsyncpa [#allocation6], 0 }
   0x2   :  { %17 = vsyncpa [#allocation9], 0 }
   0x3   :  { %18 = vsyncpa [#allocation12], 0 }
   0x4   :  { %19 = vsyncpa [#allocation15], 0 }
   0x5   :  { %20 = vsyncpa [#allocation18], 0 }
   0x6   :  { %21 = vsyncpa [#allocation4], 0  ;;  %s1274_s13 = smov [#allocation5]   ;;  %s1275_s15 = smov [#allocation8]  }
   0x7   :  { %s39_s14 = sshll.u32 %s1274_s13, 4  ;;  %s63_s16 = sshll.u32 %s1275_s15, 4  ;;  %s40_s14 = int_to_ptr.vmem [resolvable:$true] %s39_s14  ;;  %s1342_s16 = int_to_ptr.vmem [resolvable:$true] %s63_s16 }
   0x8   :  { %s1018_s19 = scalar_lea.hbm %s1523_s1, 256 }
   0x9   :  { %p1019_p0 = scmp.ne.s32.totalorder %s1523_s1, %s1018_s19  ;;  %p1022_p1 = scmp.lt.u32.totalorder %s1018_s19, %s1523_s1 }
   0xb   :  { %p1024_p2 = pnand %p1022_p1, %p1019_p0 }
   0xd   :  { %1027 = shalt.err (!%p1024_p2)
}
   0xe   :  { %s1028_s24 = scalar_lea.vmem %s40_s14, 256  ;;  %p1033_p4 = scmp.lt.s32.totalorder %s40_s14, %s40_s14 }
   0xf   :  { %p1029_p3 = scmp.ne.s32.totalorder %s40_s14, %s1028_s24  ;;  %p1034_p5 = scmp.lt.s32.totalorder %s1028_s24, %s1028_s24 }
  0x11   :  { %p1035_p6 = por %p1034_p5, %p1033_p4 }
  0x13   :  { %p1036_p7 = pnand %p1035_p6, %p1029_p3 }
  0x15   :  { %1039 = shalt.err (!%p1036_p7)
}
  0x16   :  { %s1276_s25 = smov 128   ;;  %s1277_s26 = smov 8  }
  0x17   :  { %45 = dma.hbm_to_vmem [thread:$0]  %s1523_s1, 256, %s40_s14, [#allocation6], %s1276_s25, %s1276_s25, %s1277_s26  }
  0x18   :  { %s1040_s11 = scalar_lea.hbm %s1525_s3, 2048 }
  0x19   :  { %p1041_p8 = scmp.ne.s32.totalorder %s1525_s3, %s1040_s11  ;;  %p1044_p9 = scmp.lt.u32.totalorder %s1040_s11, %s1525_s3 }
  0x1b   :  { %p1046_p10 = pnand %p1044_p9, %p1041_p8 }
  0x1d   :  { %1049 = shalt.err (!%p1046_p10)
}
  0x1e   :  { %s1050_s18 = scalar_lea.vmem %s1342_s16, 2048  ;;  %p1055_p12 = scmp.lt.s32.totalorder %s1342_s16, %s1342_s16 }
  0x1f   :  { %p1051_p11 = scmp.ne.s32.totalorder %s1342_s16, %s1050_s18  ;;  %p1056_p13 = scmp.lt.s32.totalorder %s1050_s18, %s1050_s18 }
  0x21   :  { %p1057_p0 = por %p1056_p13, %p1055_p12 }
  0x23   :  { %p1058_p1 = pnand %p1057_p0, %p1051_p11 }
  0x25   :  { %1061 = shalt.err (!%p1058_p1)
}
  0x26   :  { %69 = dma.hbm_to_vmem [thread:$0]  %s1525_s3, 2048, %s1342_s16, [#allocation9], %s1276_s25, %s1276_s25, %s1277_s26  }
  0x27   :  { %s1278_s19 = smov [#allocation11]   ;;  %s1279_s21 = smov [#allocation14]  }
  0x28   :  { %s85_s20 = sshll.u32 %s1278_s19, 4  ;;  %s110_s22 = sshll.u32 %s1279_s21, 4  ;;  %s86_s20 = int_to_ptr.vmem [resolvable:$true] %s85_s20  ;;  %s111_s22 = int_to_ptr.vmem [resolvable:$true] %s110_s22 }
  0x29   :  { %s1062_s27 = scalar_lea.hbm %s1527_s5, 2048 }
  0x2a   :  { %p1063_p2 = scmp.ne.s32.totalorder %s1527_s5, %s1062_s27  ;;  %p1066_p3 = scmp.lt.u32.totalorder %s1062_s27, %s1527_s5 }
  0x2c   :  { %p1068_p4 = pnand %p1066_p3, %p1063_p2 }
  0x2e   :  { %1071 = shalt.err (!%p1068_p4)
}
  0x2f   :  { %s1072_s3 = scalar_lea.vmem %s86_s20, 2048  ;;  %p1077_p6 = scmp.lt.s32.totalorder %s86_s20, %s86_s20 }
  0x30   :  { %p1073_p5 = scmp.ne.s32.totalorder %s86_s20, %s1072_s3  ;;  %p1078_p7 = scmp.lt.s32.totalorder %s1072_s3, %s1072_s3 }
  0x32   :  { %p1079_p8 = por %p1078_p7, %p1077_p6 }
  0x34   :  { %p1080_p9 = pnand %p1079_p8, %p1073_p5 }
  0x36   :  { %1083 = shalt.err (!%p1080_p9)
}
  0x37   :  { %91 = dma.hbm_to_vmem [thread:$0]  %s1527_s5, 2048, %s86_s20, [#allocation12], %s1276_s25, %s1276_s25, %s1277_s26  }
  0x38   :  { %s1084_s17 = scalar_lea.hbm %s1529_s7, 16 }
  0x39   :  { %p1085_p10 = scmp.ne.s32.totalorder %s1529_s7, %s1084_s17  ;;  %p1088_p11 = scmp.lt.u32.totalorder %s1084_s17, %s1529_s7 }
  0x3b   :  { %p1090_p12 = pnand %p1088_p11, %p1085_p10 }
  0x3d   :  { %1093 = shalt.err (!%p1090_p12)
}
  0x3e   :  { %s1094_s21 = scalar_lea.vmem %s111_s22, 16  ;;  %s1098_s23 = scalar_lea.vmem %s111_s22, 32 }
  0x3f   :  { %p1095_p13 = scmp.ne.s32.totalorder %s111_s22, %s1094_s21  ;;  %p1099_p0 = scmp.lt.s32.totalorder %s111_s22, %s111_s22 }
  0x40   :  { %p1100_p1 = scmp.lt.s32.totalorder %s1098_s23, %s1094_s21 }
  0x42   :  { %p1101_p2 = por %p1100_p1, %p1099_p0 }
  0x44   :  { %p1102_p3 = pnand %p1101_p2, %p1095_p13 }
  0x46   :  { %1105 = shalt.err (!%p1102_p3)
}
  0x47   :  { %113 = dma.hbm_to_vmem [thread:$0]  %s1529_s7, 16, %s111_s22, [#allocation15]  }
  0x48   :  { %s1280_s24 = smov [#allocation2]   ;;  %s1281_s28 = smov [#allocation7]  }
  0x49   :  { %s27_s27 = sshll.u32 %s1280_s24, 4  ;;  %s51_s29 = sshll.u32 %s1281_s28, 4  ;;  %s28_s27 = int_to_ptr.vmem [resolvable:$true] %s27_s27  ;;  %s1406_s29 = int_to_ptr.vmem [resolvable:$true] %s51_s29 }
  0x4a   :  { %s1106_s3 = scalar_lea.hbm %s1522_s0, 256 }
  0x4b   :  { %p1107_p4 = scmp.ne.s32.totalorder %s1522_s0, %s1106_s3  ;;  %p1110_p5 = scmp.lt.u32.totalorder %s1106_s3, %s1522_s0 }
  0x4d   :  { %p1112_p6 = pnand %p1110_p5, %p1107_p4 }
  0x4f   :  { %1115 = shalt.err (!%p1112_p6)
}
  0x50   :  { %s1116_s7 = scalar_lea.vmem %s28_s27, 256  ;;  %p1121_p8 = scmp.lt.s32.totalorder %s28_s27, %s28_s27 }
  0x51   :  { %p1117_p7 = scmp.ne.s32.totalorder %s28_s27, %s1116_s7  ;;  %p1122_p9 = scmp.lt.s32.totalorder %s1116_s7, %s1116_s7 }
  0x53   :  { %p1123_p10 = por %p1122_p9, %p1121_p8 }
  0x55   :  { %p1124_p11 = pnand %p1123_p10, %p1117_p7 }
  0x57   :  { %1127 = shalt.err (!%p1124_p11)
}
  0x58   :  { %33 = dma.hbm_to_vmem [thread:$0]  %s1522_s0, 256, %s28_s27, [#allocation3], %s1276_s25, %s1276_s25, %s1277_s26  }
  0x59   :  { %s1128_s14 = scalar_lea.hbm %s1524_s2, 2048 }
  0x5a   :  { %p1129_p12 = scmp.ne.s32.totalorder %s1524_s2, %s1128_s14  ;;  %p1132_p13 = scmp.lt.u32.totalorder %s1128_s14, %s1524_s2 }
  0x5c   :  { %p1134_p0 = pnand %p1132_p13, %p1129_p12 }
  0x5e   :  { %1137 = shalt.err (!%p1134_p0)
}
  0x5f   :  { %s1138_s20 = scalar_lea.vmem %s1406_s29, 2048  ;;  %p1143_p2 = scmp.lt.s32.totalorder %s1406_s29, %s1406_s29 }
  0x60   :  { %p1139_p1 = scmp.ne.s32.totalorder %s1406_s29, %s1138_s20  ;;  %p1144_p3 = scmp.lt.s32.totalorder %s1138_s20, %s1138_s20 }
  0x62   :  { %p1145_p4 = por %p1144_p3, %p1143_p2 }
  0x64   :  { %p1146_p5 = pnand %p1145_p4, %p1139_p1 }
  0x66   :  { %1149 = shalt.err (!%p1146_p5)
}
  0x67   :  { %57 = dma.hbm_to_vmem [thread:$0]  %s1524_s2, 2048, %s1406_s29, [#allocation6], %s1276_s25, %s1276_s25, %s1277_s26  }
  0x68   :  { %s1282_s27 = smov [#allocation10]   ;;  %s1283_s30 = smov [#allocation13]  }
  0x69   :  { %s76_s28 = sshll.u32 %s1282_s27, 4  ;;  %s97_s11 = sshll.u32 %s1283_s30, 4  ;;  %s77_s28 = int_to_ptr.vmem [resolvable:$true] %s76_s28  ;;  %s1443_s11 = int_to_ptr.vmem [resolvable:$true] %s97_s11 }
  0x6a   :  { %s1150_s12 = scalar_lea.hbm %s1526_s4, 16 }
  0x6b   :  { %p1151_p6 = scmp.ne.s32.totalorder %s1526_s4, %s1150_s12  ;;  %p1154_p7 = scmp.lt.u32.totalorder %s1150_s12, %s1526_s4 }
  0x6d   :  { %p1156_p8 = pnand %p1154_p7, %p1151_p6 }
  0x6f   :  { %1159 = shalt.err (!%p1156_p8)
}
  0x70   :  { %s1160_s2 = scalar_lea.vmem %s77_s28, 16  ;;  %s1164_s29 = scalar_lea.vmem %s77_s28, 32 }
  0x71   :  { %p1161_p9 = scmp.ne.s32.totalorder %s77_s28, %s1160_s2  ;;  %p1165_p10 = scmp.lt.s32.totalorder %s77_s28, %s77_s28 }
  0x72   :  { %p1166_p11 = scmp.lt.s32.totalorder %s1164_s29, %s1160_s2 }
  0x74   :  { %p1167_p12 = por %p1166_p11, %p1165_p10 }
  0x76   :  { %p1168_p13 = pnand %p1167_p12, %p1161_p9 }
  0x78   :  { %1171 = shalt.err (!%p1168_p13)
}
  0x79   :  { %79 = dma.hbm_to_vmem [thread:$0]  %s1526_s4, 16, %s77_s28, [#allocation9]  }
  0x7a   :  { %s1172_s19 = scalar_lea.hbm %s1528_s6, 2048 }
  0x7b   :  { %p1173_p0 = scmp.ne.s32.totalorder %s1528_s6, %s1172_s19  ;;  %p1176_p1 = scmp.lt.u32.totalorder %s1172_s19, %s1528_s6 }
  0x7d   :  { %p1178_p2 = pnand %p1176_p1, %p1173_p0 }
  0x7f   :  { %1181 = shalt.err (!%p1178_p2)
}
  0x80   :  { %s1182_s0 = scalar_lea.vmem %s1443_s11, 2048  ;;  %p1187_p4 = scmp.lt.s32.totalorder %s1443_s11, %s1443_s11 }
  0x81   :  { %p1183_p3 = scmp.ne.s32.totalorder %s1443_s11, %s1182_s0  ;;  %p1188_p5 = scmp.lt.s32.totalorder %s1182_s0, %s1182_s0 }
  0x83   :  { %p1189_p6 = por %p1188_p5, %p1187_p4 }
  0x85   :  { %p1190_p7 = pnand %p1189_p6, %p1183_p3 }
  0x87   :  { %1193 = shalt.err (!%p1190_p7)
}
  0x88   :  { %103 = dma.hbm_to_vmem [thread:$0]  %s1528_s6, 2048, %s1443_s11, [#allocation12], %s1276_s25, %s1276_s25, %s1277_s26  }
  0x89   :  { %s1284_s27 = smov [#allocation16]   ;;  %s1285_s30 = smov [#allocation17]  }
  0x8a   :  { %s120_s28 = sshll.u32 %s1284_s27, 4  ;;  %s130_s3 = sshll.u32 %s1285_s30, 4  ;;  %s121_s28 = int_to_ptr.vmem [resolvable:$true] %s120_s28  ;;  %s131_s3 = int_to_ptr.vmem [resolvable:$true] %s130_s3 }
  0x8b   :  { %s1194_s13 = scalar_lea.hbm %s1530_s8, 16 }
  0x8c   :  { %p1195_p8 = scmp.ne.s32.totalorder %s1530_s8, %s1194_s13  ;;  %p1198_p9 = scmp.lt.u32.totalorder %s1194_s13, %s1530_s8 }
  0x8e   :  { %p1200_p10 = pnand %p1198_p9, %p1195_p8 }
  0x90   :  { %1203 = shalt.err (!%p1200_p10)
}
  0x91   :  { %s1204_s6 = scalar_lea.vmem %s121_s28, 16  ;;  %s1208_s11 = scalar_lea.vmem %s121_s28, 32 }
  0x92   :  { %p1205_p11 = scmp.ne.s32.totalorder %s121_s28, %s1204_s6  ;;  %p1209_p12 = scmp.lt.s32.totalorder %s121_s28, %s121_s28 }
  0x93   :  { %p1210_p13 = scmp.lt.s32.totalorder %s1208_s11, %s1204_s6 }
  0x95   :  { %p1211_p0 = por %p1210_p13, %p1209_p12 }
  0x97   :  { %p1212_p1 = pnand %p1211_p0, %p1205_p11 }
  0x99   :  { %1215 = shalt.err (!%p1212_p1)
}
  0x9a   :  { %123 = dma.hbm_to_vmem [thread:$0]  %s1530_s8, 16, %s121_s28, [#allocation15]  }
  0x9b   :  { %s1216_s14 = scalar_lea.hbm %s1531_s9, 16 }
  0x9c   :  { %p1217_p2 = scmp.ne.s32.totalorder %s1531_s9, %s1216_s14  ;;  %p1220_p3 = scmp.lt.u32.totalorder %s1216_s14, %s1531_s9 }
  0x9e   :  { %p1222_p4 = pnand %p1220_p3, %p1217_p2 }
  0xa0   :  { %1225 = shalt.err (!%p1222_p4)
}
  0xa1   :  { %s1226_s20 = scalar_lea.vmem %s131_s3, 16  ;;  %s1230_s0 = scalar_lea.vmem %s131_s3, 32 }
  0xa2   :  { %p1227_p5 = scmp.ne.s32.totalorder %s131_s3, %s1226_s20  ;;  %p1231_p6 = scmp.lt.s32.totalorder %s131_s3, %s131_s3 }
  0xa3   :  { %p1232_p7 = scmp.lt.s32.totalorder %s1230_s0, %s1226_s20 }
  0xa5   :  { %p1233_p8 = por %p1232_p7, %p1231_p6 }
  0xa7   :  { %p1234_p9 = pnand %p1233_p8, %p1227_p5 }
  0xa9   :  { %1237 = shalt.err (!%p1234_p9)
}
  0xaa   :  { %133 = dma.hbm_to_vmem [thread:$0]  %s1531_s9, 16, %s131_s3, [#allocation18]  }
  0xab   :  { %1260 = dma.done.wait [#allocation3], 256  }
  0xac   :  { %1261 = vsyncadd [#allocation3], 4294967040 }
  0xad   :  { %1262 = dma.done.wait [#allocation6], 2304  }
  0xae   :  { %1263 = vsyncadd [#allocation6], 4294964992 }
  0xaf   :  { %1264 = dma.done.wait [#allocation9], 2064  }
  0xb0   :  { %1265 = vsyncadd [#allocation9], 4294965232 }
  0xb1   :  { %1266 = dma.done.wait [#allocation12], 4096  }
  0xb2   :  { %1267 = vsyncadd [#allocation12], 4294963200 }
  0xb3   :  { %1268 = dma.done.wait [#allocation15], 32  }
  0xb4   :  { %1269 = vsyncadd [#allocation15], 4294967264 }
  0xb5   :  { %1270 = dma.done.wait [#allocation18], 16  }
  0xb6   :  { %1271 = vsyncadd [#allocation18], 4294967280  ;;  %v184_v0 = vld [vmem:[#allocation8] sm:$0xff]  ;;  %v185_v1 = vld [vmem:[#allocation8 + $0x8] sm:$0xff]  ;;  %s1286_s9 = smov [#allocation19]  }
  0xb7   :  { %v387_v2 = vld [vmem:[#allocation13] sm:$0xff]  ;;  %v857_v3 = vpack.c.bf16 %v185_v1, %v184_v0  ;;  %v388_v4 = vld [vmem:[#allocation13 + $0x8] sm:$0xff]  ;;  %v187_v6 = vld [vmem:[#allocation8 + $0x18] sm:$0xff]  ;;  %s622_s24 = sshll.u32 %s1286_s9, 4  ;;  %s623_s24 = int_to_ptr.vmem [resolvable:$true] %s622_s24 }
  0xb8   :  { %v186_v5 = vld [vmem:[#allocation8 + $0x10] sm:$0xff]  ;;  %v921_v7 = vpack.c.bf16 %v388_v4, %v387_v2  ;;  %v390_v10 = vld [vmem:[#allocation13 + $0x18] sm:$0xff]  ;;  %v189_v13 = vld [vmem:[#allocation8 + $0x28] sm:$0xff]  ;;  %s1238_s27 = scalar_lea.vmem %s623_s24, 256  ;;  %p1243_p11 = scmp.lt.s32.totalorder %s623_s24, %s623_s24 }
  0xb9   :  { %v861_v8 = vpack.c.bf16 %v187_v6, %v186_v5  ;;  %v389_v9 = vld [vmem:[#allocation13 + $0x10] sm:$0xff]  ;;  %v188_v11 = vld [vmem:[#allocation8 + $0x20] sm:$0xff]  ;;  %858 = vmatprep.subr.bf16.mxu0 %v857_v3  ;;  %v392_v15 = vld [vmem:[#allocation13 + $0x28] sm:$0xff]  ;;  %p1239_p10 = scmp.ne.s32.totalorder %s623_s24, %s1238_s27  ;;  %p1244_p12 = scmp.lt.s32.totalorder %s1238_s27, %s1238_s27 }
  0xba   :  { %v925_v12 = vpack.c.bf16 %v390_v10, %v389_v9  ;;  %v391_v14 = vld [vmem:[#allocation13 + $0x20] sm:$0xff]  ;;  %922 = vmatprep.subr.bf16.mxu1 %v921_v7  ;;  %860 = vmatpush3.bf16.msra.mxu0 %v857_v3  ;;  %v865_v16 = vpack.c.bf16 %v189_v13, %v188_v11  ;;  %v190_v18 = vld [vmem:[#allocation8 + $0x30] sm:$0xff]  ;;  %v191_v19 = vld [vmem:[#allocation8 + $0x38] sm:$0xff] }
  0xbb   :  { %924 = vmatpush3.bf16.msra.mxu1 %v921_v7  ;;  %862 = vmatprep.subr.bf16.mxu0 %v861_v8  ;;  %v929_v17 = vpack.c.bf16 %v392_v15, %v391_v14  ;;  %v393_v20 = vld [vmem:[#allocation13 + $0x30] sm:$0xff]  ;;  %v394_v21 = vld [vmem:[#allocation13 + $0x38] sm:$0xff]  ;;  %v869_v22 = vpack.c.bf16 %v191_v19, %v190_v18  ;;  %v193_v25 = vld [vmem:[#allocation8 + $0x48] sm:$0xff]  ;;  %p1245_p13 = por %p1244_p12, %p1243_p11 }
  0xbc   :  { %926 = vmatprep.subr.bf16.mxu1 %v925_v12  ;;  %v933_v23 = vpack.c.bf16 %v394_v21, %v393_v20  ;;  %v192_v24 = vld [vmem:[#allocation8 + $0x40] sm:$0xff]  ;;  %v166_v26 = vld [vmem:[#allocation5] sm:$0xff]  ;;  %v195_v32 = vld [vmem:[#allocation8 + $0x58] sm:$0xff] }
  0xbd   :  { %v395_v27 = vld [vmem:[#allocation13 + $0x40] sm:$0xff]  ;;  %v396_v28 = vld [vmem:[#allocation13 + $0x48] sm:$0xff]  ;;  %749 = vmatprep.mubr.f32.mxu0 %v166_v26  ;;  %819 = vmatprep.mubr.f32.mxu1 %v166_v26  ;;  %v873_v29 = vpack.c.bf16 %v193_v25, %v192_v24  ;;  %v397_v33 = vld [vmem:[#allocation13 + $0x50] sm:$0xff]  ;;  %p1246_p0 = pnand %p1245_p13, %p1239_p10 }
  0xbe   :  { %864 = vmatpush3.bf16.msra.mxu0 %v861_v8  ;;  %v937_v30 = vpack.c.bf16 %v396_v28, %v395_v27  ;;  %v194_v31 = vld [vmem:[#allocation8 + $0x50] sm:$0xff]  ;;  %v398_v34 = vld [vmem:[#allocation13 + $0x58] sm:$0xff]  ;;  %v197_v38 = vld [vmem:[#allocation8 + $0x68] sm:$0xff] }
  0xbf   :  { %928 = vmatpush3.bf16.msra.mxu1 %v925_v12  ;;  %866 = vmatprep.subr.bf16.mxu0 %v865_v16  ;;  %v877_v35 = vpack.c.bf16 %v195_v32, %v194_v31  ;;  %v941_v36 = vpack.c.bf16 %v398_v34, %v397_v33  ;;  %v196_v37 = vld [vmem:[#allocation8 + $0x60] sm:$0xff]  ;;  %v400_v40 = vld [vmem:[#allocation13 + $0x68] sm:$0xff]  ;;  %v199_v44 = vld [vmem:[#allocation8 + $0x78] sm:$0xff] }
  0xc0   :  { %930 = vmatprep.subr.bf16.mxu1 %v929_v17  ;;  %v399_v39 = vld [vmem:[#allocation13 + $0x60] sm:$0xff]  ;;  %v881_v41 = vpack.c.bf16 %v197_v38, %v196_v37  ;;  %v198_v43 = vld [vmem:[#allocation8 + $0x70] sm:$0xff]  ;;  %v402_v46 = vld [vmem:[#allocation13 + $0x78] sm:$0xff] }
  0xc1   :  { %v945_v42 = vpack.c.bf16 %v400_v40, %v399_v39  ;;  %v401_v45 = vld [vmem:[#allocation13 + $0x70] sm:$0xff]  ;;  %v885_v47 = vpack.c.bf16 %v199_v44, %v198_v43  ;;  %v168_v49 = vld [vmem:[#allocation7] sm:$0xff]  ;;  %v169_v50 = vld [vmem:[#allocation7 + $0x8] sm:$0xff] }
  0xc2   :  { %868 = vmatpush3.bf16.msra.mxu0 %v865_v16  ;;  %v949_v48 = vpack.c.bf16 %v402_v46, %v401_v45  ;;  %v371_v51 = vld [vmem:[#allocation11] sm:$0xff]  ;;  %v372_v52 = vld [vmem:[#allocation11 + $0x8] sm:$0xff]  ;;  %v889_v53 = vpack.c.bf16 %v169_v50, %v168_v49  ;;  %v171_v56 = vld [vmem:[#allocation7 + $0x18] sm:$0xff] }
  0xc3   :  { %932 = vmatpush3.bf16.msra.mxu1 %v929_v17  ;;  %870 = vmatprep.subr.bf16.mxu0 %v869_v22  ;;  %v953_v54 = vpack.c.bf16 %v372_v52, %v371_v51  ;;  %v170_v55 = vld [vmem:[#allocation7 + $0x10] sm:$0xff]  ;;  %v374_v58 = vld [vmem:[#allocation11 + $0x18] sm:$0xff]  ;;  %v173_v63 = vld [vmem:[#allocation7 + $0x28] sm:$0xff] }
  0xc4   :  { %934 = vmatprep.subr.bf16.mxu1 %v933_v23  ;;  %v373_v57 = vld [vmem:[#allocation11 + $0x10] sm:$0xff]  ;;  %v893_v60 = vpack.c.bf16 %v171_v56, %v170_v55  ;;  %v172_v62 = vld [vmem:[#allocation7 + $0x20] sm:$0xff]  ;;  %v376_v1 = vld [vmem:[#allocation11 + $0x28] sm:$0xff] }
  0xc5   :  { %v167_v59 = vld [vmem:[#allocation5 + $0x8] sm:$0xff]  ;;  %v957_v61 = vpack.c.bf16 %v374_v58, %v373_v57  ;;  %v375_v0 = vld [vmem:[#allocation11 + $0x20] sm:$0xff]  ;;  %v897_v3 = vpack.c.bf16 %v173_v63, %v172_v62  ;;  %v174_v5 = vld [vmem:[#allocation7 + $0x30] sm:$0xff]  ;;  %v578_v62 = vlaneseq }
  0xc6   :  { %872 = vmatpush3.bf16.msra.mxu0 %v869_v22  ;;  %v1501_v2 = vld [vmem:[#allocation2] sm:$0xff]  ;;  %v961_v4 = vpack.c.bf16 %v376_v1, %v375_v0  ;;  %v175_v6 = vld [vmem:[#allocation7 + $0x38] sm:$0xff]  ;;  %v177_v12 = vld [vmem:[#allocation7 + $0x48] sm:$0xff] }
  0xc7   :  { %936 = vmatpush3.bf16.msra.mxu1 %v933_v23  ;;  %874 = vmatprep.subr.bf16.mxu0 %v873_v29  ;;  %v377_v7 = vld [vmem:[#allocation11 + $0x30] sm:$0xff]  ;;  %v378_v8 = vld [vmem:[#allocation11 + $0x38] sm:$0xff]  ;;  %v901_v9 = vpack.c.bf16 %v175_v6, %v174_v5  ;;  %v379_v13 = vld [vmem:[#allocation11 + $0x40] sm:$0xff]  ;;  %v579_v63 = vand.u32 127, %v578_v62 }
  0xc8   :  { %938 = vmatprep.subr.bf16.mxu1 %v937_v30  ;;  %v965_v10 = vpack.c.bf16 %v378_v8, %v377_v7  ;;  %v176_v11 = vld [vmem:[#allocation7 + $0x40] sm:$0xff]  ;;  %v380_v14 = vld [vmem:[#allocation11 + $0x48] sm:$0xff]  ;;  %v179_v18 = vld [vmem:[#allocation7 + $0x58] sm:$0xff] }
  0xc9   :  { %v905_v15 = vpack.c.bf16 %v177_v12, %v176_v11  ;;  %v969_v16 = vpack.c.bf16 %v380_v14, %v379_v13  ;;  %v178_v17 = vld [vmem:[#allocation7 + $0x50] sm:$0xff]  ;;  %v382_v20 = vld [vmem:[#allocation11 + $0x58] sm:$0xff]  ;;  %v181_v24 = vld [vmem:[#allocation7 + $0x68] sm:$0xff]  ;;  %vm580_vm0 = vcmp.lt.s32.totalorder %v579_v63, 32 }
  0xca   :  { %876 = vmatpush3.bf16.msra.mxu0 %v873_v29  ;;  %v381_v19 = vld [vmem:[#allocation11 + $0x50] sm:$0xff]  ;;  %v909_v21 = vpack.c.bf16 %v179_v18, %v178_v17  ;;  %v180_v23 = vld [vmem:[#allocation7 + $0x60] sm:$0xff]  ;;  %v384_v26 = vld [vmem:[#allocation11 + $0x68] sm:$0xff] }
  0xcb   :  { %940 = vmatpush3.bf16.msra.mxu1 %v937_v30  ;;  %878 = vmatprep.subr.bf16.mxu0 %v877_v35  ;;  %v973_v22 = vpack.c.bf16 %v382_v20, %v381_v19  ;;  %v383_v25 = vld [vmem:[#allocation11 + $0x60] sm:$0xff]  ;;  %v913_v27 = vpack.c.bf16 %v181_v24, %v180_v23  ;;  %v182_v29 = vld [vmem:[#allocation7 + $0x70] sm:$0xff]  ;;  %v183_v30 = vld [vmem:[#allocation7 + $0x78] sm:$0xff] }
  0xcc   :  { %942 = vmatprep.subr.bf16.mxu1 %v941_v36  ;;  %v977_v28 = vpack.c.bf16 %v384_v26, %v383_v25  ;;  %v385_v31 = vld [vmem:[#allocation11 + $0x70] sm:$0xff]  ;;  %v386_v32 = vld [vmem:[#allocation11 + $0x78] sm:$0xff]  ;;  %v917_v33 = vpack.c.bf16 %v183_v30, %v182_v29  ;;  %v642_v45 = vld [vmem:[#allocation14] ss:$0 sm:$0xff] }
  0xcd   :  { %v981_v34 = vpack.c.bf16 %v386_v32, %v385_v31  ;;  %v643_v17 = vld [vmem:[#allocation16] ss:$0 sm:$0xff]  ;;  %v644_v19 = vld [vmem:[#allocation17] ss:$0 sm:$0xff] }
  0xce   :  { %880 = vmatpush3.bf16.msra.mxu0 %v877_v35  ;;  %v165_v35 = vld [vmem:[#allocation2 + $0x8] sm:$0xff] }
  0xcf   :  { %944 = vmatpush3.bf16.msra.mxu1 %v941_v36  ;;  %882 = vmatprep.subr.bf16.mxu0 %v881_v41  ;;  %v639_v36 = vld [vmem:[#allocation10] ss:$0 sm:$0xff] }
  0xd0   :  { %946 = vmatprep.subr.bf16.mxu1 %v945_v42 }
  0xd2   :  { %884 = vmatpush3.bf16.msra.mxu0 %v881_v41 }
  0xd3   :  { %948 = vmatpush3.bf16.msra.mxu1 %v945_v42  ;;  %886 = vmatprep.subr.bf16.mxu0 %v885_v47 }
  0xd4   :  { %950 = vmatprep.subr.bf16.mxu1 %v949_v48 }
  0xd6   :  { %888 = vmatpush3.bf16.msra.mxu0 %v885_v47 }
  0xd7   :  { %952 = vmatpush3.bf16.msra.mxu1 %v949_v48  ;;  %890 = vmatprep.subr.bf16.mxu0 %v889_v53 }
  0xd8   :  { %954 = vmatprep.subr.bf16.mxu1 %v953_v54 }
  0xd9   :  { %750 = vmatmul.mubr.f32.vlgmr.msra.gmra.mrb[0].mxu0 %v167_v59 }
  0xda   :  { %892 = vmatpush3.bf16.msra.mxu0 %v889_v53  ;;  %820 = vmatmul.mubr.f32.vlgmr.msra.gmra.mrb[0].mxu1 %v167_v59 }
  0xdb   :  { %956 = vmatpush3.bf16.msra.mxu1 %v953_v54  ;;  %894 = vmatprep.subr.bf16.mxu0 %v893_v60 }
  0xdc   :  { %958 = vmatprep.subr.bf16.mxu1 %v957_v61  ;;  %784 = vmatprep.mubr.f32.mxu0 %v1501_v2 }
  0xdd   :  { %854 = vmatprep.mubr.f32.mxu1 %v1501_v2 }
  0xde   :  { %896 = vmatpush3.bf16.msra.mxu0 %v893_v60 }
  0xdf   :  { %960 = vmatpush3.bf16.msra.mxu1 %v957_v61  ;;  %898 = vmatprep.subr.bf16.mxu0 %v897_v3 }
  0xe0   :  { %962 = vmatprep.subr.bf16.mxu1 %v961_v4 }
  0xe2   :  { %900 = vmatpush3.bf16.msra.mxu0 %v897_v3 }
  0xe3   :  { %964 = vmatpush3.bf16.msra.mxu1 %v961_v4  ;;  %902 = vmatprep.subr.bf16.mxu0 %v901_v9 }
  0xe4   :  { %966 = vmatprep.subr.bf16.mxu1 %v965_v10 }
  0xe6   :  { %904 = vmatpush3.bf16.msra.mxu0 %v901_v9 }
  0xe7   :  { %968 = vmatpush3.bf16.msra.mxu1 %v965_v10  ;;  %906 = vmatprep.subr.bf16.mxu0 %v905_v15 }
  0xe8   :  { %970 = vmatprep.subr.bf16.mxu1 %v969_v16 }
  0xea   :  { %908 = vmatpush3.bf16.msra.mxu0 %v905_v15 }
  0xeb   :  { %972 = vmatpush3.bf16.msra.mxu1 %v969_v16  ;;  %910 = vmatprep.subr.bf16.mxu0 %v909_v21 }
  0xec   :  { %974 = vmatprep.subr.bf16.mxu1 %v973_v22 }
  0xee   :  { %912 = vmatpush3.bf16.msra.mxu0 %v909_v21 }
  0xef   :  { %976 = vmatpush3.bf16.msra.mxu1 %v973_v22  ;;  %914 = vmatprep.subr.bf16.mxu0 %v913_v27 }
  0xf0   :  { %978 = vmatprep.subr.bf16.mxu1 %v977_v28 }
  0xf2   :  { %916 = vmatpush3.bf16.msra.mxu0 %v913_v27 }
  0xf3   :  { %980 = vmatpush3.bf16.msra.mxu1 %v977_v28  ;;  %918 = vmatprep.subr.bf16.mxu0 %v917_v33 }
  0xf4   :  { %982 = vmatprep.subr.bf16.mxu1 %v981_v34 }
  0xf6   :  { %920 = vmatpush3.bf16.msra.mxu0 %v917_v33 }
  0xf7   :  { %984 = vmatpush3.bf16.msra.mxu1 %v981_v34 }
  0xf9   :  { %785 = vmatmul.mubr.f32.vlgmr.msra.gmra.mrb[0].mxu0 %v165_v35 }
  0xfa   :  { %855 = vmatmul.mubr.f32.vlgmr.msra.gmra.mrb[0].mxu1 %v165_v35 }
 0x1cc   :  { %v786_v37 = vpop.f32.mrb[0].mxu0 }
 0x1cd   :  { %v358_v38 = vadd.f32 %v786_v37, %v639_v36  ;;  %v856_v39 = vpop.f32.mrb[0].mxu1  ;;  %v341_v40 = vpop.f32.mrb[1].mxu0 }
 0x1ce   :  { %v357_v41 = vadd.f32 %v639_v36, %v341_v40  ;;  %v544_v42 = vpop.f32.mrb[1].mxu1  ;;  %v561_v46 = vadd.f32 %v856_v39, %v642_v45 }
 0x1cf   :  { %v641_v43 = vmul.f32 -1.442695, %v358_v38  ;;  %v560_v47 = vadd.f32 %v642_v45, %v544_v42 }
 0x1d0   :  { %v640_v44 = vmul.f32 -1.442695, %v357_v41 }
 0x1d1   :  { %1002 = vpow2.f32 %v641_v43 }
 0x1d2   :  { %1004 = vpow2.f32 %v640_v44 }
 0x1d3   :  { %1006 = vtanh.f32 %v561_v46 }
 0x1d4   :  { %1008 = vtanh.f32 %v560_v47 }
 0x1db   :  { %v1003_v48 = vpop.eup %1002 }
 0x1dc   :  { %v1005_v49 = vpop.eup %1004  ;;  %v366_v50 = vadd.f32 1.0, %v1003_v48 }
 0x1dd   :  { %v365_v51 = vadd.f32 1.0, %v1005_v49  ;;  %v1007_v52 = vpop.eup %1006 }
 0x1de   :  { %1010 = vrcp.f32 %v366_v50  ;;  %v1009_v53 = vpop.eup %1008  ;;  %v565_v54 = vsub.f32 %v1007_v52, %v165_v35 }
 0x1df   :  { %1012 = vrcp.f32 %v365_v51  ;;  %v564_v56 = vsub.f32 %v1009_v53, %v1501_v2 }
 0x1e8   :  { %v1011_v55 = vpop.eup %1010 }
 0x1e9   :  { %v1013_v57 = vpop.eup %1012  ;;  %v567_v58 = vmul.f32 %v1011_v55, %v565_v54 }
 0x1ea   :  { %v566_v59 = vmul.f32 %v1013_v57, %v564_v56 }
 0x1eb   :  { %v569_v61 = vadd.f32 %v567_v58, %v165_v35 }
 0x1ec   :  { %v568_v60 = vadd.f32 %v566_v59, %v1501_v2 }
 0x1ee   :  { %570 = vadd.xlane.f32.xlu0 %v568_v60 }
 0x1f2   :  { %572 = vadd.xlane.f32.xlu0 %v569_v61 }
 0x27b   :  { %v571_v0 = vpop.xlane.xlu0 %570 }
 0x27c   :  { %v574_v1 = vmul.f32 0.03125, %v571_v0 }
 0x27e   :  { %v576_v3 = vsub.f32 %v568_v60, %v574_v1 }
 0x27f   :  { %v573_v4 = vpop.xlane.xlu0 %572 }
 0x280   :  { %v575_v5 = vmul.f32 0.03125, %v573_v4  ;;  %v581_v6 = vsel %vm580_vm0, %v576_v3, 0.0 }
 0x281   :  { %v583_v7 = vmul.f32 %v581_v6, %v581_v6 }
 0x282   :  { %v577_v8 = vsub.f32 %v569_v61, %v575_v5 }
 0x283   :  { %585 = vadd.xlane.f32.xlu1 %v583_v7 }
 0x284   :  { %v582_v9 = vsel %vm580_vm0, %v577_v8, 0.0 }
 0x285   :  { %v584_v10 = vmul.f32 %v582_v9, %v582_v9 }
 0x287   :  { %587 = vadd.xlane.f32.xlu1 %v584_v10 }
 0x310   :  { %v586_v11 = vpop.xlane.xlu1 %585 }
 0x311   :  { %v589_v2 = vmul.f32 0.03125, %v586_v11 }
 0x313   :  { %v591_v12 = vadd.f32 1e-05, %v589_v2 }
 0x314   :  { %v588_v13 = vpop.xlane.xlu1 %587 }
 0x315   :  { %1014 = vrsqrt.f32 %v591_v12  ;;  %v590_v14 = vmul.f32 0.03125, %v588_v13 }
 0x317   :  { %v592_v15 = vadd.f32 1e-05, %v590_v14 }
 0x319   :  { %1016 = vrsqrt.f32 %v592_v15 }
 0x31f   :  { %v1015_v16 = vpop.eup %1014 }
 0x320   :  { %v595_v18 = vmul.f32 %v1015_v16, %v576_v3 }
 0x322   :  { %v604_v20 = vmul.f32 %v643_v17, %v595_v18 }
 0x323   :  { %v1017_v21 = vpop.eup %1016 }
 0x324   :  { %v596_v22 = vmul.f32 %v1017_v21, %v577_v8  ;;  %v613_v23 = vadd.f32 %v644_v19, %v604_v20 }
 0x326   :  { %v605_v24 = vmul.f32 %v643_v17, %v596_v22  ;;  %615 = vst [vmem:[#allocation19] sm:$0xff] %v613_v23 }
 0x328   :  { %v614_v25 = vadd.f32 %v644_v19, %v605_v24 }
 0x32a   :  { %616 = vst [vmem:[#allocation19 + $0x8] sm:$0xff] %v614_v25 }
 0x32b   :  { %1249 = shalt.err (!%p1246_p0)
}
 0x32c   :  { %s1250_s3 = scalar_lea.hbm %s1532_s10, 256 }
 0x32d   :  { %p1251_p1 = scmp.ne.s32.totalorder %s1532_s10, %s1250_s3  ;;  %p1254_p2 = scmp.lt.u32.totalorder %s1250_s3, %s1532_s10 }
 0x32f   :  { %p1256_p3 = pnand %p1254_p2, %p1251_p1 }
 0x331   :  { %1259 = shalt.err (!%p1256_p3)
}
 0x332   :  { %628 = dma.vmem_to_hbm [thread:$0]  %s623_s24, 256, %s1532_s10, [#allocation4], %s1276_s25, %s1276_s25, %s1277_s26  }
 0x333   :  { %1272 = dma.done.wait [#allocation4], 256  }
 0x334   :  { %1273 = vsyncadd [#allocation4], 4294967040 }
 0x335   :  { %632 = vsyncpa [#allocation3], 1 }
 0x336   :  { %633 = vsyncpa [#allocation6], 1 }
 0x337   :  { %634 = vsyncpa [#allocation9], 1 }
 0x338   :  { %635 = vsyncpa [#allocation12], 1 }
 0x339   :  { %636 = vsyncpa [#allocation15], 1 }
 0x33a   :  { %637 = vsyncpa [#allocation18], 1 }
 0x33b   :  { %638 = vsyncpa [#allocation4], 1 }

</bundles_post_ra>
